<compile_context>
chip_gen: v7x
topology: tpu7x:2x2x1
jax: 0.10.0
libtpu: 0.0.40
codegen_flags: <defaults>
</compile_context>

<pallas_src>
import functools

import jax
import jax.numpy as jnp
from jax.experimental import pallas as pl
from jax.experimental.pallas import tpu as pltpu


def dqn_kernel(x_ref,
               w1_ref, b1_ref,
               w2_ref, b2_ref,
               w3_ref, b3_ref,
               w4_ref, b4_ref,
               w5_ref, b5_ref,
               o_ref):
    # fc1 + relu  (bf16 MXU inputs, f32 accumulate, f32 bias / ReLU)
    h = x_ref[...].astype(jnp.bfloat16)
    h = jnp.dot(h, w1_ref[...], preferred_element_type=jnp.float32)
    h = jnp.maximum(h + b1_ref[...], 0.0)
    # dropout1 (p=0.2): identity at inference time
    # fc2 + relu
    h = jnp.dot(h.astype(jnp.bfloat16), w2_ref[...],
                preferred_element_type=jnp.float32)
    h = jnp.maximum(h + b2_ref[...], 0.0)
    # fc3 + relu
    h = jnp.dot(h.astype(jnp.bfloat16), w3_ref[...],
                preferred_element_type=jnp.float32)
    h = jnp.maximum(h + b3_ref[...], 0.0)
    # dropout2 (p=0.1): identity at inference time
    # fc4 + relu
    h = jnp.dot(h.astype(jnp.bfloat16), w4_ref[...],
                preferred_element_type=jnp.float32)
    h = jnp.maximum(h + b4_ref[...], 0.0)
    # fc5 (no activation)
    h = jnp.dot(h.astype(jnp.bfloat16), w5_ref[...],
                preferred_element_type=jnp.float32)
    o_ref[...] = (h + b5_ref[...]).astype(o_ref.dtype)


def _round_up(n, m):
    return ((n + m - 1) // m) * m


@functools.partial(jax.jit, static_argnames=("tb",))
def dq_network_forward(x, params, *, tb=2048):
    """x: (B, 6) float32. params: flat list [w1, b1, ..., w5, b5] with
    weights shaped (in, out) float32 and biases shaped (1, out) float32.

    tb: batch tile size (rounded to the actual batch when B is small).
    """
    B, F = x.shape
    out_dim = params[-1].shape[-1]

    # Cast weights once to bf16 (MXU-native on v5e/v6e/v7x); keep biases f32.
    cast = []
    for i, p in enumerate(params):
        cast.append(p.astype(jnp.bfloat16) if i % 2 == 0 else p)

    # Pad the batch to a multiple of the tile (sublane granularity = 8).
    tb = min(tb, _round_up(B, 8))
    Bp = _round_up(B, tb)
    if Bp != B:
        x = jnp.pad(x, ((0, Bp - B), (0, 0)))

    grid = (Bp // tb,)
    in_specs = [pl.BlockSpec((tb, F), lambda i: (i, 0))]
    for p in cast:
        # Constant index_map -> weights/biases stay resident in VMEM.
        in_specs.append(pl.BlockSpec(p.shape, lambda i: (0, 0)))
    out_specs = pl.BlockSpec((tb, out_dim), lambda i: (i, 0))

    out = pl.pallas_call(
        dqn_kernel,
        out_shape=jax.ShapeDtypeStruct((Bp, out_dim), jnp.float32),
        grid=grid,
        in_specs=in_specs,
        out_specs=out_specs,
        compiler_params=pltpu.CompilerParams(
            dimension_semantics=("parallel",)),
    )(x, *cast)
    return out[:B]


def init_params(key):
    """Deterministic init matching torch.nn.Linear default:
    U(-1/sqrt(fan_in), 1/sqrt(fan_in)) for both weight and bias."""
    dims = [(6, 256), (256, 128), (128, 64), (64, 32), (32, 5)]
    params = []
    for (fan_in, fan_out) in dims:
        key, kw, kb = jax.random.split(key, 3)
        bound = 1.0 / jnp.sqrt(float(fan_in))
        w = jax.random.uniform(kw, (fan_in, fan_out), jnp.float32, -bound, bound)
        b = jax.random.uniform(kb, (1, fan_out), jnp.float32, -bound, bound)
        params.append(w)
        params.append(b)
    return params


def _bf16(a):
    return a.astype(jnp.bfloat16).astype(jnp.float32)


def reference_forward_bf16(x, params):
    """Pure-JAX reference mirroring the kernel's numerics: bf16 weights /
    activations with f32 accumulation, f32 bias + ReLU."""
    h = _bf16(x)
    for i in range(0, 8, 2):
        h = jnp.maximum(h @ _bf16(params[i]) + params[i + 1], 0.0)
        h = _bf16(h)
    return h @ _bf16(params[8]) + params[9]


def reference_forward_f32(x, params):
    h = x
    for i in range(0, 8, 2):
        h = jnp.maximum(h @ params[i] + params[i + 1], 0.0)
    return h @ params[8] + params[9]


if __name__ == "__main__":
    key = jax.random.PRNGKey(0)
    key, kx = jax.random.split(key)
    B = 32
    x = jax.random.normal(kx, (B, 6), jnp.float32)
    params = init_params(key)

    # Small tile so the test exercises multiple grid steps (grid=(4,)).
    out = dq_network_forward(x, params, tb=8)
    out = jax.block_until_ready(out)
    assert out.shape == (B, 5), out.shape

    # Also exercise the single-tile path (grid=(1,), tb rounded to batch).
    out_big = jax.block_until_ready(dq_network_forward(x, params, tb=2048))
    assert jnp.allclose(out, out_big, atol=1e-6, rtol=1e-6), "tile-size mismatch"

    # Tight check against a bf16-aware reference; loose check vs f32 torch math.
    ref_bf16 = reference_forward_bf16(x, params)
    ref_f32 = reference_forward_f32(x, params)
    assert jnp.allclose(out, ref_bf16, atol=1e-3, rtol=1e-3), "mismatch vs bf16 reference"
    assert jnp.allclose(out, ref_f32, atol=3e-2, rtol=3e-2), "mismatch vs f32 reference"
    print("KERNEL_OK")
</pallas_src>

<mosaic_0001>
module attributes {stable_mosaic.version = 11 : i64} {
  func.func @dqn_kernel(%arg0: i32, %arg1: memref<8x6xf32, #tpu.memory_space<vmem>>, %arg2: memref<6x256xbf16, #tpu.memory_space<vmem>>, %arg3: memref<1x256xf32, #tpu.memory_space<vmem>>, %arg4: memref<256x128xbf16, #tpu.memory_space<vmem>>, %arg5: memref<1x128xf32, #tpu.memory_space<vmem>>, %arg6: memref<128x64xbf16, #tpu.memory_space<vmem>>, %arg7: memref<1x64xf32, #tpu.memory_space<vmem>>, %arg8: memref<64x32xbf16, #tpu.memory_space<vmem>>, %arg9: memref<1x32xf32, #tpu.memory_space<vmem>>, %arg10: memref<32x5xbf16, #tpu.memory_space<vmem>>, %arg11: memref<1x5xf32, #tpu.memory_space<vmem>>, %arg12: memref<8x5xf32, #tpu.memory_space<vmem>>) attributes {dimension_semantics = [#tpu.dimension_semantics<parallel>], iteration_bounds = array<i64: 4>, scalar_prefetch = 0 : i64, scratch_operands = 0 : i64, tpu.core_type = #tpu.core_type<tc>, window_params = [{transform_indices = @transform_0, window_bounds = array<i64: 8, 6>}, {pipeline_mode = #tpu.pipeline_mode<synchronous>, transform_indices = @transform_1, window_bounds = array<i64: 6, 256>}, {pipeline_mode = #tpu.pipeline_mode<synchronous>, transform_indices = @transform_2, window_bounds = array<i64: 1, 256>}, {pipeline_mode = #tpu.pipeline_mode<synchronous>, transform_indices = @transform_3, window_bounds = array<i64: 256, 128>}, {pipeline_mode = #tpu.pipeline_mode<synchronous>, transform_indices = @transform_4, window_bounds = array<i64: 1, 128>}, {pipeline_mode = #tpu.pipeline_mode<synchronous>, transform_indices = @transform_5, window_bounds = array<i64: 128, 64>}, {pipeline_mode = #tpu.pipeline_mode<synchronous>, transform_indices = @transform_6, window_bounds = array<i64: 1, 64>}, {pipeline_mode = #tpu.pipeline_mode<synchronous>, transform_indices = @transform_7, window_bounds = array<i64: 64, 32>}, {pipeline_mode = #tpu.pipeline_mode<synchronous>, transform_indices = @transform_8, window_bounds = array<i64: 1, 32>}, {pipeline_mode = #tpu.pipeline_mode<synchronous>, transform_indices = @transform_9, window_bounds = array<i64: 32, 5>}, {pipeline_mode = #tpu.pipeline_mode<synchronous>, transform_indices = @transform_10, window_bounds = array<i64: 1, 5>}, {transform_indices = @transform_11, window_bounds = array<i64: 8, 5>}]} {
    %c0 = arith.constant 0 : index
    %c0_0 = arith.constant 0 : index
    %0 = vector.load %arg1[%c0, %c0_0] : memref<8x6xf32, #tpu.memory_space<vmem>>, vector<8x6xf32>
    %1 = arith.truncf %0 : vector<8x6xf32> to vector<8x6xbf16>
    %c0_1 = arith.constant 0 : index
    %c0_2 = arith.constant 0 : index
    %2 = vector.load %arg2[%c0_1, %c0_2] : memref<6x256xbf16, #tpu.memory_space<vmem>>, vector<6x256xbf16>
    %cst = arith.constant dense<0.000000e+00> : vector<8x256xf32>
    %3 = tpu.matmul %1, %2, %cst {dimension_numbers = #tpu.dot_dimension_numbers<[1], [0], [0], [1], [0, 0, 1, 1], [], []>} : vector<8x6xbf16>, vector<6x256xbf16>, vector<8x256xf32> -> vector<8x256xf32>
    %c0_3 = arith.constant 0 : index
    %c0_4 = arith.constant 0 : index
    %4 = vector.load %arg3[%c0_3, %c0_4] : memref<1x256xf32, #tpu.memory_space<vmem>>, vector<1x256xf32>
    %5 = vector.broadcast %4 : vector<1x256xf32> to vector<8x256xf32>
    %6 = arith.addf %3, %5 : vector<8x256xf32>
    %cst_5 = arith.constant 0.000000e+00 : f32
    %7 = vector.broadcast %cst_5 : f32 to vector<8x256xf32>
    %8 = arith.maximumf %6, %7 : vector<8x256xf32>
    %9 = arith.truncf %8 : vector<8x256xf32> to vector<8x256xbf16>
    %c0_6 = arith.constant 0 : index
    %c0_7 = arith.constant 0 : index
    %10 = vector.load %arg4[%c0_6, %c0_7] : memref<256x128xbf16, #tpu.memory_space<vmem>>, vector<256x128xbf16>
    %cst_8 = arith.constant dense<0.000000e+00> : vector<8x128xf32>
    %11 = tpu.matmul %9, %10, %cst_8 {dimension_numbers = #tpu.dot_dimension_numbers<[1], [0], [0], [1], [0, 0, 1, 1], [], []>} : vector<8x256xbf16>, vector<256x128xbf16>, vector<8x128xf32> -> vector<8x128xf32>
    %c0_9 = arith.constant 0 : index
    %c0_10 = arith.constant 0 : index
    %12 = vector.load %arg5[%c0_9, %c0_10] : memref<1x128xf32, #tpu.memory_space<vmem>>, vector<1x128xf32>
    %13 = vector.broadcast %12 : vector<1x128xf32> to vector<8x128xf32>
    %14 = arith.addf %11, %13 : vector<8x128xf32>
    %cst_11 = arith.constant 0.000000e+00 : f32
    %15 = vector.broadcast %cst_11 : f32 to vector<8x128xf32>
    %16 = arith.maximumf %14, %15 : vector<8x128xf32>
    %17 = arith.truncf %16 : vector<8x128xf32> to vector<8x128xbf16>
    %c0_12 = arith.constant 0 : index
    %c0_13 = arith.constant 0 : index
    %18 = vector.load %arg6[%c0_12, %c0_13] : memref<128x64xbf16, #tpu.memory_space<vmem>>, vector<128x64xbf16>
    %cst_14 = arith.constant dense<0.000000e+00> : vector<8x64xf32>
    %19 = tpu.matmul %17, %18, %cst_14 {dimension_numbers = #tpu.dot_dimension_numbers<[1], [0], [0], [1], [0, 0, 1, 1], [], []>} : vector<8x128xbf16>, vector<128x64xbf16>, vector<8x64xf32> -> vector<8x64xf32>
    %c0_15 = arith.constant 0 : index
    %c0_16 = arith.constant 0 : index
    %20 = vector.load %arg7[%c0_15, %c0_16] : memref<1x64xf32, #tpu.memory_space<vmem>>, vector<1x64xf32>
    %21 = vector.broadcast %20 : vector<1x64xf32> to vector<8x64xf32>
    %22 = arith.addf %19, %21 : vector<8x64xf32>
    %cst_17 = arith.constant 0.000000e+00 : f32
    %23 = vector.broadcast %cst_17 : f32 to vector<8x64xf32>
    %24 = arith.maximumf %22, %23 : vector<8x64xf32>
    %25 = arith.truncf %24 : vector<8x64xf32> to vector<8x64xbf16>
    %c0_18 = arith.constant 0 : index
    %c0_19 = arith.constant 0 : index
    %26 = vector.load %arg8[%c0_18, %c0_19] : memref<64x32xbf16, #tpu.memory_space<vmem>>, vector<64x32xbf16>
    %cst_20 = arith.constant dense<0.000000e+00> : vector<8x32xf32>
    %27 = tpu.matmul %25, %26, %cst_20 {dimension_numbers = #tpu.dot_dimension_numbers<[1], [0], [0], [1], [0, 0, 1, 1], [], []>} : vector<8x64xbf16>, vector<64x32xbf16>, vector<8x32xf32> -> vector<8x32xf32>
    %c0_21 = arith.constant 0 : index
    %c0_22 = arith.constant 0 : index
    %28 = vector.load %arg9[%c0_21, %c0_22] : memref<1x32xf32, #tpu.memory_space<vmem>>, vector<1x32xf32>
    %29 = vector.broadcast %28 : vector<1x32xf32> to vector<8x32xf32>
    %30 = arith.addf %27, %29 : vector<8x32xf32>
    %cst_23 = arith.constant 0.000000e+00 : f32
    %31 = vector.broadcast %cst_23 : f32 to vector<8x32xf32>
    %32 = arith.maximumf %30, %31 : vector<8x32xf32>
    %33 = arith.truncf %32 : vector<8x32xf32> to vector<8x32xbf16>
    %c0_24 = arith.constant 0 : index
    %c0_25 = arith.constant 0 : index
    %34 = vector.load %arg10[%c0_24, %c0_25] : memref<32x5xbf16, #tpu.memory_space<vmem>>, vector<32x5xbf16>
    %cst_26 = arith.constant dense<0.000000e+00> : vector<8x5xf32>
    %35 = tpu.matmul %33, %34, %cst_26 {dimension_numbers = #tpu.dot_dimension_numbers<[1], [0], [0], [1], [0, 0, 1, 1], [], []>} : vector<8x32xbf16>, vector<32x5xbf16>, vector<8x5xf32> -> vector<8x5xf32>
    %c0_27 = arith.constant 0 : index
    %c0_28 = arith.constant 0 : index
    %36 = vector.load %arg11[%c0_27, %c0_28] : memref<1x5xf32, #tpu.memory_space<vmem>>, vector<1x5xf32>
    %37 = vector.broadcast %36 : vector<1x5xf32> to vector<8x5xf32>
    %38 = arith.addf %35, %37 : vector<8x5xf32>
    %c0_29 = arith.constant 0 : index
    %c0_30 = arith.constant 0 : index
    %39 = vector.load %arg12[%c0_29, %c0_30] : memref<8x5xf32, #tpu.memory_space<vmem>>, vector<8x5xf32>
    tpu.vector_store %arg12[%c0_29, %c0_30], %38 {strides = array<i32>} : memref<8x5xf32, #tpu.memory_space<vmem>>, vector<8x5xf32>,
    return
  }
  func.func @transform_0(%arg0: i32) -> (i32, i32) {
    %c0_i32 = arith.constant 0 : i32
    %c0_i32_0 = arith.constant 0 : i32
    return %arg0, %c0_i32 : i32, i32
  }
  func.func @transform_1(%arg0: i32) -> (i32, i32) {
    %c0_i32 = arith.constant 0 : i32
    %c0_i32_0 = arith.constant 0 : i32
    %c0_i32_1 = arith.constant 0 : i32
    return %c0_i32, %c0_i32_0 : i32, i32
  }
  func.func @transform_2(%arg0: i32) -> (i32, i32) {
    %c0_i32 = arith.constant 0 : i32
    %c0_i32_0 = arith.constant 0 : i32
    %c0_i32_1 = arith.constant 0 : i32
    return %c0_i32, %c0_i32_0 : i32, i32
  }
  func.func @transform_3(%arg0: i32) -> (i32, i32) {
    %c0_i32 = arith.constant 0 : i32
    %c0_i32_0 = arith.constant 0 : i32
    %c0_i32_1 = arith.constant 0 : i32
    return %c0_i32, %c0_i32_0 : i32, i32
  }
  func.func @transform_4(%arg0: i32) -> (i32, i32) {
    %c0_i32 = arith.constant 0 : i32
    %c0_i32_0 = arith.constant 0 : i32
    %c0_i32_1 = arith.constant 0 : i32
    return %c0_i32, %c0_i32_0 : i32, i32
  }
  func.func @transform_5(%arg0: i32) -> (i32, i32) {
    %c0_i32 = arith.constant 0 : i32
    %c0_i32_0 = arith.constant 0 : i32
    %c0_i32_1 = arith.constant 0 : i32
    return %c0_i32, %c0_i32_0 : i32, i32
  }
  func.func @transform_6(%arg0: i32) -> (i32, i32) {
    %c0_i32 = arith.constant 0 : i32
    %c0_i32_0 = arith.constant 0 : i32
    %c0_i32_1 = arith.constant 0 : i32
    return %c0_i32, %c0_i32_0 : i32, i32
  }
  func.func @transform_7(%arg0: i32) -> (i32, i32) {
    %c0_i32 = arith.constant 0 : i32
    %c0_i32_0 = arith.constant 0 : i32
    %c0_i32_1 = arith.constant 0 : i32
    return %c0_i32, %c0_i32_0 : i32, i32
  }
  func.func @transform_8(%arg0: i32) -> (i32, i32) {
    %c0_i32 = arith.constant 0 : i32
    %c0_i32_0 = arith.constant 0 : i32
    %c0_i32_1 = arith.constant 0 : i32
    return %c0_i32, %c0_i32_0 : i32, i32
  }
  func.func @transform_9(%arg0: i32) -> (i32, i32) {
    %c0_i32 = arith.constant 0 : i32
    %c0_i32_0 = arith.constant 0 : i32
    %c0_i32_1 = arith.constant 0 : i32
    return %c0_i32, %c0_i32_0 : i32, i32
  }
  func.func @transform_10(%arg0: i32) -> (i32, i32) {
    %c0_i32 = arith.constant 0 : i32
    %c0_i32_0 = arith.constant 0 : i32
    %c0_i32_1 = arith.constant 0 : i32
    return %c0_i32, %c0_i32_0 : i32, i32
  }
  func.func @transform_11(%arg0: i32) -> (i32, i32) {
    %c0_i32 = arith.constant 0 : i32
    %c0_i32_0 = arith.constant 0 : i32
    return %arg0, %c0_i32 : i32, i32
  }
}

</mosaic_0001>

<bundles_post_ra>
// kernel: dq_network_forward.1
= control target key start
LH: loop header
LB: loop body
LE: loop exit
PB: predicated region body
PF: predicated region fallthrough
CT: control target
= control target key end

     0   :  { %s1198_s17 = smov 0   ;;  %s1350_s0 = inlined_call_operand.vmem [shape: f32[32,6], index: 0, kind: input, shape index: {}]   ;;  %s1351_s1 = inlined_call_operand.vmem [shape: bf16[6,256], index: 1, kind: input, shape index: {}]   ;;  %s1352_s2 = inlined_call_operand.vmem [shape: f32[1,256], index: 2, kind: input, shape index: {}]   ;;  %s1353_s3 = inlined_call_operand.vmem [shape: bf16[256,128], index: 3, kind: input, shape index: {}]   ;;  %s1354_s4 = inlined_call_operand.vmem [shape: f32[1,128], index: 4, kind: input, shape index: {}]   ;;  %s1355_s5 = inlined_call_operand.vmem [shape: bf16[128,64], index: 5, kind: input, shape index: {}]   ;;  %s1356_s6 = inlined_call_operand.vmem [shape: f32[1,64], index: 6, kind: input, shape index: {}]   ;;  %s1357_s7 = inlined_call_operand.vmem [shape: bf16[64,32], index: 7, kind: input, shape index: {}]   ;;  %s1358_s8 = inlined_call_operand.vmem [shape: f32[1,32], index: 8, kind: input, shape index: {}]   ;;  %s1359_s9 = inlined_call_operand.vmem [shape: bf16[32,5], index: 9, kind: input, shape index: {}]   ;;  %s1360_s10 = inlined_call_operand.vmem [shape: f32[1,5], index: 10, kind: input, shape index: {}]   ;;  %s1361_s11 = inlined_call_operand.vmem [shape: f32[32,5], index: 11, kind: output, shape index: {}]  }
   0x1 LB: > { %s956_s18 = sadd.s32 4294967295, %s1133_s17   ;;  %p960_p0 = scmp.ge.s32.totalorder %s1133_s17, 1  ;;  %s1133_s17 = sphi %s1198_s17, %s21_s17  }
   0x2   : > { %p336_p1 = scmp.lt.s32.totalorder %s1133_s17, 5 }
   0x4   : > { %p337_p2 = pnand %p960_p0, %p336_p1 }
   0x5   : > { %v385_v0 = vld [vmem:[%s1351_s1] sm:$0x77] (!%p337_p2)  ;;  %vm407_vm0 = vcmask (!%p337_p2), 1042432   ;;  %p374_p3 = scmp.lt.s32.totalorder (!%p337_p2), %s956_s18, 3  ;;  %v1135_v3 = vmov (!%p337_p2), 0   ;;  %v1099_v7 = vld [vmem:[%s1353_s3 + $0x48] sm:$0xff] (!%p337_p2)   ;;  %v388_v30 = vlaneseq (!%p337_p2) }
   0x6   : > { %340 = sbr.rel (%p337_p2) target bundleno = 1111 (0x457), region = 64  ;;  %v964_v1 = vcombine.high (!%p337_p2), %v385_v0, %v385_v0  ;;  %v963_v2 = vcombine.low (!%p337_p2), %v385_v0, %v385_v0  ;;  %446 = vmatprep.mubr.bf16.mxu0 (!%p337_p2), %v1135_v3  ;;  %v1097_v4 = vld [vmem:[%s1353_s3 + $0x40] sm:$0xff] (!%p337_p2)   ;;  %v1100_v8 = vld [vmem:[%s1353_s3 + $0x8] sm:$0xff] (!%p337_p2)   ;;  %v1101_v9 = vld [vmem:[%s1353_s3 + $0x50] sm:$0xff] (!%p337_p2)   ;;  %vm403_vm1 = vcmask (!%p337_p2), 48128   ;;  %v1136_v24 = vmov (!%p337_p2), 0.0  }
   0x7   : > { %v1098_v5 = vld [vmem:[%s1353_s3] sm:$0xff] (!%p337_p2)   ;;  %1005 = vmatprep.subr.bf16.mxu1 (!%p337_p2), %v1097_v4  ;;  %v1102_v12 = vld [vmem:[%s1353_s3 + $0x10] sm:$0xff] (!%p337_p2)   ;;  %v1103_v13 = vld [vmem:[%s1353_s3 + $0x58] sm:$0xff] (!%p337_p2)   ;;  %v389_v31 = vshrl.u32 (!%p337_p2), %v388_v30, 7  ;;  %vm1137_vm2 = vmmov (!%p337_p2), 0   ;;  %vm788_vm3 = vcmask (!%p337_p2), 523264  }
   0x8   : > { %965 = vmatprep.subr.msk.bf16.mxu0 (!%p337_p2), %vm407_vm0, %v964_v1  ;;  %v409_v6 = vsel (!%p337_p2), %vm407_vm0, %v963_v2, 0  ;;  %1006 = vmatpush3.bf16.msra.mxu1 (!%p337_p2), %v1098_v5  ;;  %v1104_v14 = vld [vmem:[%s1353_s3 + $0x18] sm:$0xff] (!%p337_p2)   ;;  %v1105_v15 = vld [vmem:[%s1353_s3 + $0x60] sm:$0xff] (!%p337_p2)   ;;  %v1107_v17 = vld [vmem:[%s1353_s3 + $0x68] sm:$0xff] (!%p337_p2)   ;;  %vm857_vm4 = vcmask (!%p337_p2), 261120   ;;  %vm901_vm5 = vcmask (!%p337_p2), 39936  }
   0x9   : > { %415 = vmatpush1.bf16.msra.mxu0 (!%p337_p2), %v409_v6  ;;  %1007 = vmatprep.subr.bf16.mxu1 (!%p337_p2), %v1099_v7  ;;  %v1106_v16 = vld [vmem:[%s1353_s3 + $0x20] sm:$0xff] (!%p337_p2)   ;;  %v1108_v18 = vld [vmem:[%s1353_s3 + $0x28] sm:$0xff] (!%p337_p2)   ;;  %v1109_v19 = vld [vmem:[%s1353_s3 + $0x70] sm:$0xff] (!%p337_p2)   ;;  %v390_v32 = vsub.s32 (!%p337_p2), 0, %v389_v31  ;;  %v394_v34 = vsub.s32 (!%p337_p2), 1, %v389_v31 }
   0xa   : > { %v1110_v20 = vld [vmem:[%s1353_s3 + $0x30] sm:$0xff] (!%p337_p2)   ;;  %v1111_v21 = vld [vmem:[%s1353_s3 + $0x78] sm:$0xff] (!%p337_p2)   ;;  %v1113_v23 = vld [vmem:[%s1355_s5] sm:$0xff] (!%p337_p2)   ;;  %1044 = vmatprep.subr.bf16.mxu0 (!%p337_p2), %v1136_v24 }
   0xb   : > { %v1112_v22 = vld [vmem:[%s1353_s3 + $0x38] sm:$0xff] (!%p337_p2)   ;;  %v1114_v25 = vld [vmem:[%s1355_s5 + $0x8] sm:$0xff] (!%p337_p2)   ;;  %v1115_v26 = vld [vmem:[%s1355_s5 + $0x10] sm:$0xff] (!%p337_p2)  }
   0xc   : > { %1008 = vmatpush3.bf16.msra.mxu1 (!%p337_p2), %v1100_v8  ;;  %v1116_v27 = vld [vmem:[%s1355_s5 + $0x18] sm:$0xff] (!%p337_p2)   ;;  %v1117_v28 = vld [vmem:[%s1355_s5 + $0x20] sm:$0xff] (!%p337_p2)   ;;  %v1118_v29 = vld [vmem:[%s1355_s5 + $0x28] sm:$0xff] (!%p337_p2)  }
   0xd   : > { %s1363_s18 = smov (!%p374_p3, %s956_s18), 3  ;;  %1009 = vmatprep.subr.bf16.mxu1 %v1101_v9  ;;  %v386_v33 = vld [vmem:[%s1352_s2] sm:$0x3]  ;;  %v1119_v47 = vld [vmem:[%s1355_s5 + $0x30] sm:$0xff]   ;;  %v1120_v48 = vld [vmem:[%s1355_s5 + $0x38] sm:$0xff]  }
   0xe   : > { %s961_s27 = sshll.u32 %s1363_s18, 3  ;;  %v391_v35 = vrot.slane %v386_v33, %v390_v32  ;;  %v395_v36 = vrot.slane %v386_v33, %v394_v34  ;;  %v1121_v49 = vld [vmem:[%s1357_s7] sm:$0xff]   ;;  %v1122_v50 = vld [vmem:[%s1357_s7 + $0x8] sm:$0xff]   ;;  %v1123_v60 = vld [vmem:[%s1357_s7 + $0x10] sm:$0xff]  }
   0xf   : > { %s377_s13 = scalar_lea.vmem %s1350_s0, %s961_s27  ;;  %v967_v52 = vld [vmem:[%s1354_s4] ss:$0 sm:$0xff]  ;;  %v1124_v61 = vld [vmem:[%s1357_s7 + $0x18] sm:$0xff]   ;;  %v1126_v7 = vld [vmem:[%s1359_s9 + $0x8] sm:$0xff]   ;;  %s381_s14 = scalar_lea.vmem %s1361_s11, %s961_s27 }
  0x10   : > { %v383_v10 = vld [vmem:[%s377_s13] sm:$0xff]  ;;  %1010 = vmatpush3.bf16.msra.mxu1 %v1102_v12 }
  0x11   : > { %v384_v11 = vpack.c.bf16 %v383_v10, %v383_v10  ;;  %1011 = vmatprep.subr.bf16.mxu1 %v1103_v13  ;;  %v1125_v62 = vld [vmem:[%s1359_s9] sm:$0xff]  }
  0x12   : > { %v984_v63 = vld [vmem:[%s1356_s6] ss:$0 sm:$0xff] }
  0x13   : > { %966 = vmatmul.mubr.msk.bf16.vlgmr.msra.gmra.mrb[0].mxu0 %vm403_vm1, %v384_v11  ;;  %v993_v8 = vld [vmem:[%s1358_s8] ss:$0 sm:$0xff] }
  0x14   : > { %1012 = vmatpush3.bf16.msra.mxu1 %v1104_v14  ;;  %1045 = vmatpush3.bf16.msra.mxu0 %v1113_v23 }
  0x15   : > { %1013 = vmatprep.subr.bf16.mxu1 %v1105_v15  ;;  %1046 = vmatprep.subr.bf16.mxu0 %v1136_v24 }
  0x16   : > { %1060 = vmatprep.mubr.msk.bf16.mxu0 %vm1137_vm2, %v1136_v24 }
  0x18   : > { %1014 = vmatpush3.bf16.msra.mxu1 %v1106_v16  ;;  %1047 = vmatpush3.bf16.msra.mxu0 %v1114_v25  ;;  %v999_v16 = vld [vmem:[%s1360_s10] ss:$0 sm:$0xff] }
  0x19   : > { %1015 = vmatprep.subr.bf16.mxu1 %v1107_v17  ;;  %1048 = vmatprep.subr.bf16.mxu0 %v1136_v24 }
  0x1c   : > { %1016 = vmatpush3.bf16.msra.mxu1 %v1108_v18  ;;  %1049 = vmatpush3.bf16.msra.mxu0 %v1115_v26 }
  0x1d   : > { %1017 = vmatprep.subr.bf16.mxu1 %v1109_v19  ;;  %1050 = vmatprep.subr.bf16.mxu0 %v1136_v24 }
  0x20   : > { %1018 = vmatpush3.bf16.msra.mxu1 %v1110_v20  ;;  %1051 = vmatpush3.bf16.msra.mxu0 %v1116_v27 }
  0x21   : > { %1019 = vmatprep.subr.bf16.mxu1 %v1111_v21  ;;  %1052 = vmatprep.subr.bf16.mxu0 %v1136_v24 }
  0x24   : > { %1020 = vmatpush3.bf16.msra.mxu1 %v1112_v22  ;;  %1053 = vmatpush3.bf16.msra.mxu0 %v1117_v28 }
  0x25   : > { %1064 = vmatprep.subr.bf16.mxu1 %v1136_v24  ;;  %1054 = vmatprep.subr.bf16.mxu0 %v1136_v24 }
  0x28   : > { %1055 = vmatpush3.bf16.msra.mxu0 %v1118_v29 }
  0x29   : > { %1056 = vmatprep.subr.bf16.mxu0 %v1136_v24 }
  0x2c   : > { %1057 = vmatpush3.bf16.msra.mxu0 %v1119_v47 }
  0x2d   : > { %1058 = vmatprep.subr.bf16.mxu0 %v1136_v24 }
  0x30   : > { %1059 = vmatpush3.bf16.msra.mxu0 %v1120_v48 }
  0x31   : > { %1076 = vmatprep.subr.bf16.mxu0 %v1136_v24 }
  0xe6   : > { %v448_v37 = vpop.f32.mrb[0].mxu0 }
  0xe7   : > { %v449_v38 = vadd.f32 %v448_v37, %v391_v35  ;;  %v450_v39 = vpop.f32.mrb[1].mxu0 }
  0xe8   : > { %v451_v40 = vadd.f32 %v450_v39, %v395_v36  ;;  %v452_v41 = vpop.f32.mrb[2].mxu0 }
  0xe9   : > { %v455_v42 = vmax.f32 %v449_v38, 0.0  ;;  %v453_v43 = vpop.f32.mrb[3].mxu0 }
  0xea   : > { %v456_v44 = vmax.f32 %v451_v40, 0.0 }
  0xeb   : > { %v457_v46 = vpack.c.bf16 %v455_v42, %v455_v42 }
  0xec   : > { %v458_v45 = vpack.c.bf16 %v456_v44, %v456_v44 }
  0xee   : > { %626 = vmatprep.mubr.bf16.mxu1 %v458_v45 }
  0xef   : > { %627 = vmatmul.mubr.bf16.vlgmr.msra.gmra.mrb[0].mxu1 %v457_v46 }
  0xf0   : > { %1072 = vmatprep.mubr.msk.bf16.mxu1 %vm1137_vm2, %v1136_v24  ;;  %1065 = vmatpush3.bf16.msra.mxu1 %v1121_v49 }
  0xf1   : > { %1066 = vmatprep.subr.bf16.mxu1 %v1136_v24 }
  0xf4   : > { %1067 = vmatpush3.bf16.msra.mxu1 %v1122_v50 }
  0xf5   : > { %1068 = vmatprep.subr.bf16.mxu1 %v1136_v24 }
  0xf8   : > { %1069 = vmatpush3.bf16.msra.mxu1 %v1123_v60 }
  0xf9   : > { %1070 = vmatprep.subr.bf16.mxu1 %v1136_v24 }
  0xfc   : > { %1071 = vmatpush3.bf16.msra.mxu1 %v1124_v61 }
 0x1c2   : > { %v1021_v51 = vpop.f32.mrb[0].mxu1 }
 0x1c3   : > { %v1022_v53 = vpop.f32.mrb[1].mxu1 }
 0x1c4   : > { %v1023_v54 = vadd.f32 %v1022_v53, %v1021_v51  ;;  %v1024_v55 = vpop.f32.mrb[2].mxu1 }
 0x1c5   : > { %v1025_v56 = vpop.f32.mrb[3].mxu1 }
 0x1c6   : > { %v629_v57 = vadd.f32 %v1023_v54, %v967_v52 }
 0x1c8   : > { %v634_v58 = vmax.f32 %v629_v57, 0.0 }
 0x1ca   : > { %v635_v59 = vpack.c.bf16 %v634_v58, %v634_v58 }
 0x1cc   : > { %1061 = vmatmul.mubr.bf16.vlgmr.msra.gmra.mrb[4].mxu0 %v635_v59 }
 0x1cd   : > { %1080 = vmatprep.mubr.msk.bf16.mxu0 %vm1137_vm2, %v1136_v24  ;;  %1077 = vmatpush3.bf16.msra.mxu0 %v1125_v62 }
 0x1ce   : > { %1078 = vmatprep.subr.bf16.mxu0 %v1136_v24 }
 0x1d1   : > { %1079 = vmatpush3.bf16.msra.mxu0 %v1126_v7 }
 0x29f   : > { %v741_v0 = vpop.f32.mrb[4].mxu0 }
 0x2a0   : > { %v742_v1 = vadd.f32 %v984_v63, %v741_v0  ;;  %v1062_v2 = vpop.f32.mrb[5].mxu0 }
 0x2a1   : > { %v744_v3 = vpop.f32.mrb[6].mxu0 }
 0x2a2   : > { %v747_v4 = vmax.f32 %v742_v1, 0.0  ;;  %v1063_v5 = vpop.f32.mrb[7].mxu0 }
 0x2a4   : > { %v748_v6 = vpack.c.bf16 %v747_v4, %v747_v4 }
 0x2a6   : > { %1073 = vmatmul.mubr.msk.bf16.vlgmr.msra.gmra.mrb[4].mxu1 %vm788_vm3, %v748_v6 }
 0x379   : > { %v826_v9 = vpop.f32.mrb[4].mxu1 }
 0x37a   : > { %v827_v10 = vadd.f32 %v993_v8, %v826_v9  ;;  %v1074_v11 = vpop.f32.mrb[5].mxu1 }
 0x37b   : > { %v829_v12 = vpop.f32.mrb[6].mxu1 }
 0x37c   : > { %v832_v13 = vmax.f32 %v827_v10, 0.0  ;;  %v1075_v14 = vpop.f32.mrb[7].mxu1 }
 0x37e   : > { %v833_v15 = vpack.c.bf16 %v832_v13, %v832_v13 }
 0x380   : > { %1081 = vmatmul.mubr.msk.bf16.vlgmr.msra.gmra.mrb[8].mxu0 %vm857_vm4, %v833_v15 }
 0x453   : > { %v895_v17 = vpop.f32.mrb[8].mxu0 }
 0x454   : > { %v896_v18 = vadd.f32 %v999_v16, %v895_v17  ;;  %v1082_v19 = vpop.f32.mrb[9].mxu0 }
 0x455   : > { %v898_v20 = vpop.f32.mrb[10].mxu0 }
 0x456   : > { %902 = vst.msk [vmem:[%s381_s14] sm:$0xff] %vm901_vm5, %v896_v18  ;;  %v1083_v21 = vpop.f32.mrb[11].mxu0 }
 0x457 PF: > { %s21_s17 = sadd.s32 1, %s1133_s17  }
 0x458   : > { %p18_p4 = scmp.ge.s32.totalorder %s21_s17, 6  }
 0x45a   :  { %20 = sbr.rel (!%p18_p4) target bundleno = 1 (0x1), region = 94 }

</bundles_post_ra>
